<compile_context>
chip_gen: v5e
topology: v5e:2x2
jax: 0.10.0
libtpu: 0.0.40
codegen_flags: <defaults>
</compile_context>

<pallas_src>
import functools

import jax
import jax.numpy as jnp
from jax.experimental import pallas as pl
from jax.experimental.pallas import tpu as pltpu


def _round_up(v, m):
    return ((v + m - 1) // m) * m


def _vmem_capacity_bytes():
    """Per-core VMEM capacity; conservative 64 MiB (v7x) if the query fails."""
    try:
        return int(pltpu.get_tpu_info().vmem_capacity_bytes)
    except Exception:
        return 64 * 1024 * 1024


def _choose_tiles(tb_for_sizing, k_pad, m_pad, w_isize, s_isize, budget_bytes):
    """Largest lane-dense (TK, TM) tiles whose double-buffered working set fits."""

    def fits(tk, tm):
        w_bytes = 2 * tk * tm * w_isize        # weight tile (double-buffered)
        s_bytes = 2 * tb_for_sizing * tk * s_isize
        o_bytes = 2 * tb_for_sizing * tm * 4   # f32 resident output/accumulator
        b_bytes = 2 * tm * 4
        return w_bytes + s_bytes + o_bytes + b_bytes <= budget_bytes

    tm_cands = [t for t in range(min(m_pad, 2048), 0, -128) if m_pad % t == 0]
    tk_cands = [k_pad] + [t for t in range(min(k_pad, 2048), 0, -128)
                          if k_pad % t == 0 and t != k_pad]
    for tm in tm_cands:
        for tk in tk_cands:
            if fits(tk, tm):
                return tk, tm
    return 128, 128  # last resort: deepest grid, still compiles for huge graphs


def _ng_tick_kernel(state_ref, wt_ref, b_ref, out_ref):
    # state_ref: (TB, TK)   weight-dtype, live prefix of the graph state
    # wt_ref:    (TK, TM)   weight-dtype, contiguous pre-tiled corner of W^T
    # b_ref:     (1, TM)    f32 bias tile (out_nodes order)
    # out_ref:   (TB, TM)   f32, resident across the reduction (k) axis
    k = pl.program_id(2)

    @pl.when(k == 0)
    def _init():
        out_ref[...] = jnp.broadcast_to(b_ref[...], out_ref.shape)

    out_ref[...] += jnp.dot(state_ref[...], wt_ref[...],
                            preferred_element_type=jnp.float32)


@functools.partial(jax.jit, static_argnames=("tb", "tk", "tm", "vmem_limit_bytes"))
def _ng_tick(state, wt_tiled, b_row, *, tb, tk, tm, vmem_limit_bytes):
    """(B_pad, K_pad) @ corner-W^T (K_pad, M_pad) + bias -> (B_pad, M_pad) f32."""
    b_pad, k_pad = state.shape
    n_m = wt_tiled.shape[0]
    m_pad = n_m * tm
    grid = (b_pad // tb, n_m, k_pad // tk)
    return pl.pallas_call(
        _ng_tick_kernel,
        out_shape=jax.ShapeDtypeStruct((b_pad, m_pad), jnp.float32),
        grid=grid,
        in_specs=[
            # State tile; resident across output tiles, streamed across K tiles.
            pl.BlockSpec((tb, tk), lambda i, j, k: (i, k)),
            # Pre-tiled weights (n_m, K_pad, TM): each (TK, TM) block is a single
            # fully contiguous DMA.  Leading dim is squeezed out of the kernel ref.
            pl.BlockSpec((None, tk, tm), lambda i, j, k: (j, k, 0)),
            # Lane-dense bias tile.
            pl.BlockSpec((1, tm), lambda i, j, k: (0, j)),
        ],
        # Output block index constant along k -> stays resident as the accumulator.
        out_specs=pl.BlockSpec((tb, tm), lambda i, j, k: (i, j)),
        compiler_params=pltpu.CompilerParams(
            dimension_semantics=("parallel", "parallel", "arbitrary"),
            vmem_limit_bytes=vmem_limit_bytes,
        ),
    )(state, wt_tiled, b_row)


class NGPallas:
    """JAX/Pallas equivalent of the PyTorch NG module's forward pass."""

    def __init__(self, in_features, out_features, nodes=10, key=None,
                 weight_dtype=jnp.float32, xla_fast_path=False):
        assert nodes > in_features + out_features, "全部节点数量不能少于输入输出节点数量"
        self.nodes_num = nodes
        self.in_features = in_features
        self.out_features = out_features
        self.weight_dtype = jnp.dtype(weight_dtype)
        self.xla_fast_path = xla_fast_path

        if key is None:
            key = jax.random.PRNGKey(42)
        kw, kb = jax.random.split(key)
        # nn.Linear(nodes, 1) default init: U(-1/sqrt(fan_in), 1/sqrt(fan_in)).
        bound = 1.0 / (nodes ** 0.5)
        # Row n of W = weight vector of node n (the n-th Linear(nodes, 1)).
        W = jax.random.uniform(kw, (nodes, nodes), jnp.float32, -bound, bound)
        b = jax.random.uniform(kb, (nodes,), jnp.float32, -bound, bound)
        self.W_f32 = W            # full parameters, kept for the pure-JAX reference
        self.b_f32 = b

        # forward() reads only next_state[out_nodes] and the state is nonzero only on
        # the first in_features entries -> only W[out_nodes, :in_features] matters.
        # Column m of the corner corresponds to out_node (nodes-1-m), so the kernel
        # output is already in out_nodes order (no flip needed).
        node_ids = nodes - 1 - jnp.arange(out_features)
        Wt_corner = W[node_ids, :in_features].T          # (in_features, out_features)
        b_corner = b[node_ids]                           # (out_features,)

        self.k_pad = _round_up(in_features, 128)         # lane-dense reduction axis
        self.m_pad = _round_up(out_features, 128)        # lane-dense output axis
        Wt_pad = jnp.pad(
            Wt_corner,
            ((0, self.k_pad - in_features), (0, self.m_pad - out_features)))
        self.Wt_flat = Wt_pad.astype(self.weight_dtype)  # used by the XLA fast path
        self.b_pad = jnp.pad(b_corner, (0, self.m_pad - out_features)
                             ).reshape(1, self.m_pad).astype(jnp.float32)

        # Sublane packing for the state dtype: f32 -> 8 rows, bf16 -> 16, int8 -> 32.
        self.sub_pack = max(8, 32 // self.weight_dtype.itemsize)
        self.tb_cap = 256   # batch tile cap (also used for VMEM sizing)

        vmem_cap = _vmem_capacity_bytes()
        self.vmem_limit = int(min(vmem_cap * 3 // 4, 100 * 1024 * 1024))
        budget = int(vmem_cap * 0.45)
        self.tk, self.tm = _choose_tiles(
            min(self.tb_cap, 512), self.k_pad, self.m_pad,
            self.weight_dtype.itemsize, self.weight_dtype.itemsize, budget)

        # Pre-tile the weights ONCE into contiguous (n_m, K_pad, TM) slabs.
        n_m = self.m_pad // self.tm
        self.Wt_tiled = (self.Wt_flat.reshape(self.k_pad, n_m, self.tm)
                         .transpose(1, 0, 2))

    def __call__(self, x):
        x = jnp.asarray(x, jnp.float32)
        squeeze = x.ndim == 1
        if squeeze:
            x = x[None, :]
        batch = x.shape[0]

        # Batch tiling: one tile for small batches; 256-row "parallel" tiles for big
        # batches (gives v7x's second TensorCore work, amortizes weight traffic).
        if batch <= 2 * self.tb_cap:
            tb = _round_up(batch, self.sub_pack)
            b_pad = tb
        else:
            tb = self.tb_cap
            b_pad = _round_up(batch, tb)

        # state = zeros(nodes); state[in_nodes] = x  -> the live prefix of the padded
        # state is built by one contiguous pad (in_nodes are the leading indices).
        state = jnp.pad(x, ((0, b_pad - batch), (0, self.k_pad - self.in_features)))
        state = state.astype(self.weight_dtype)

        if self.xla_fast_path:
            # Tiny-graph fast path: at demo sizes everything fits one tile and the
            # kernel launch overhead dominates; plain XLA is strictly faster.
            nxt = jnp.dot(state, self.Wt_flat,
                          preferred_element_type=jnp.float32) + self.b_pad
        else:
            nxt = _ng_tick(state, self.Wt_tiled, self.b_pad,
                           tb=tb, tk=self.tk, tm=self.tm,
                           vmem_limit_bytes=self.vmem_limit)

        out = nxt[:batch, :self.out_features]   # already in out_nodes order
        return out[0] if squeeze else out


def ng_reference(model: NGPallas, x):
    """Pure-JAX reference implementing the PyTorch forward verbatim (full W)."""
    x = jnp.asarray(x, jnp.float32)
    squeeze = x.ndim == 1
    if squeeze:
        x = x[None, :]
    n = model.nodes_num
    xs = x.astype(model.weight_dtype).astype(jnp.float32)   # mirror in-kernel cast
    state = jnp.zeros((x.shape[0], n), jnp.float32).at[:, :model.in_features].set(xs)
    W = model.W_f32.astype(model.weight_dtype).astype(jnp.float32)
    next_state = state @ W.T + model.b_f32
    out_nodes = jnp.array([n - i - 1 for i in range(model.out_features)], jnp.int32)
    out = next_state[:, out_nodes]
    return out[0] if squeeze else out


if __name__ == "__main__":
    in_features, out_features, nodes = 4, 3, 10
    batch = 2

    kx, _ = jax.random.split(jax.random.PRNGKey(0))
    x = jax.random.normal(kx, (batch, in_features), dtype=jnp.float32)

    model = NGPallas(in_features, out_features, nodes, key=jax.random.PRNGKey(42))

    # Batched path (runs the Pallas kernel).
    out = jax.block_until_ready(model(x))
    ref = ng_reference(model, x)
    assert out.shape == (batch, out_features), out.shape
    assert jnp.allclose(out, ref, atol=1e-4, rtol=1e-4), (out, ref)

    # Single-sample path (matches the original PyTorch forward signature).
    out1 = jax.block_until_ready(model(x[0]))
    ref1 = ng_reference(model, x[0])
    assert out1.shape == (out_features,), out1.shape
    assert jnp.allclose(out1, ref1, atol=1e-4, rtol=1e-4), (out1, ref1)

    print("KERNEL_OK")
</pallas_src>

<mosaic_0001>
module attributes {stable_mosaic.version = 11 : i64} {
  func.func @_ng_tick_kernel(%arg0: i32, %arg1: i32, %arg2: i32, %arg3: memref<8x128xf32, #tpu.memory_space<vmem>>, %arg4: memref<1x128x128xf32, #tpu.memory_space<vmem>>, %arg5: memref<1x128xf32, #tpu.memory_space<vmem>>, %arg6: memref<8x128xf32, #tpu.memory_space<vmem>>) attributes {dimension_semantics = [#tpu.dimension_semantics<parallel>, #tpu.dimension_semantics<parallel>, #tpu.dimension_semantics<arbitrary>], iteration_bounds = array<i64: 1, 1, 1>, scalar_prefetch = 0 : i64, scratch_operands = 0 : i64, tpu.core_type = #tpu.core_type<tc>, window_params = [{transform_indices = @transform_0, window_bounds = array<i64: 8, 128>}, {transform_indices = @transform_1, window_bounds = array<i64: 1, 128, 128>}, {transform_indices = @transform_2, window_bounds = array<i64: 1, 128>}, {transform_indices = @transform_3, window_bounds = array<i64: 8, 128>}]} {
    %c0_i32 = arith.constant 0 : i32
    %0 = arith.cmpi eq, %arg2, %c0_i32 : i32
    %1 = arith.extui %0 : i1 to i32
    %c0_i32_0 = arith.constant 0 : i32
    %2 = arith.cmpi ne, %1, %c0_i32_0 : i32
    scf.if %2 {
      %c0_9 = arith.constant 0 : index
      %c0_10 = arith.constant 0 : index
      %10 = vector.load %arg5[%c0_9, %c0_10] : memref<1x128xf32, #tpu.memory_space<vmem>>, vector<1x128xf32>
      %11 = vector.shape_cast %10 : vector<1x128xf32> to vector<1x128xf32>
      %12 = vector.broadcast %11 : vector<1x128xf32> to vector<8x128xf32>
      %c0_11 = arith.constant 0 : index
      %c0_12 = arith.constant 0 : index
      %13 = vector.load %arg6[%c0_11, %c0_12] : memref<8x128xf32, #tpu.memory_space<vmem>>, vector<8x128xf32>
      tpu.vector_store %arg6[%c0_11, %c0_12], %12 {strides = array<i32>} : memref<8x128xf32, #tpu.memory_space<vmem>>, vector<8x128xf32>,
    } else {
    }
    %c0 = arith.constant 0 : index
    %c0_1 = arith.constant 0 : index
    %3 = vector.load %arg6[%c0, %c0_1] : memref<8x128xf32, #tpu.memory_space<vmem>>, vector<8x128xf32>
    %c0_2 = arith.constant 0 : index
    %c0_3 = arith.constant 0 : index
    %4 = vector.load %arg3[%c0_2, %c0_3] : memref<8x128xf32, #tpu.memory_space<vmem>>, vector<8x128xf32>
    %c0_4 = arith.constant 0 : index
    %c0_5 = arith.constant 0 : index
    %c0_6 = arith.constant 0 : index
    %5 = vector.load %arg4[%c0_4, %c0_5, %c0_6] : memref<1x128x128xf32, #tpu.memory_space<vmem>>, vector<1x128x128xf32>
    %6 = vector.shape_cast %5 : vector<1x128x128xf32> to vector<128x128xf32>
    %cst = arith.constant dense<0.000000e+00> : vector<8x128xf32>
    %7 = tpu.matmul %4, %6, %cst {dimension_numbers = #tpu.dot_dimension_numbers<[1], [0], [0], [1], [0, 0, 1, 1], [], []>} : vector<8x128xf32>, vector<128x128xf32>, vector<8x128xf32> -> vector<8x128xf32>
    %8 = arith.addf %3, %7 : vector<8x128xf32>
    %c0_7 = arith.constant 0 : index
    %c0_8 = arith.constant 0 : index
    %9 = vector.load %arg6[%c0_7, %c0_8] : memref<8x128xf32, #tpu.memory_space<vmem>>, vector<8x128xf32>
    tpu.vector_store %arg6[%c0_7, %c0_8], %8 {strides = array<i32>} : memref<8x128xf32, #tpu.memory_space<vmem>>, vector<8x128xf32>,
    return
  }
  func.func @transform_0(%arg0: i32, %arg1: i32, %arg2: i32) -> (i32, i32) {
    %c0_i32 = arith.constant 0 : i32
    return %arg0, %arg2 : i32, i32
  }
  func.func @transform_1(%arg0: i32, %arg1: i32, %arg2: i32) -> (i32, i32, i32) {
    %c0_i32 = arith.constant 0 : i32
    %c0_i32_0 = arith.constant 0 : i32
    return %arg1, %arg2, %c0_i32 : i32, i32, i32
  }
  func.func @transform_2(%arg0: i32, %arg1: i32, %arg2: i32) -> (i32, i32) {
    %c0_i32 = arith.constant 0 : i32
    %c0_i32_0 = arith.constant 0 : i32
    return %c0_i32, %arg1 : i32, i32
  }
  func.func @transform_3(%arg0: i32, %arg1: i32, %arg2: i32) -> (i32, i32) {
    %c0_i32 = arith.constant 0 : i32
    return %arg0, %arg1 : i32, i32
  }
}

</mosaic_0001>

<bundles_post_ra>
// kernel: _ng_tick.1
= control target key start
LH: loop header
LB: loop body
LE: loop exit
PB: predicated region body
PF: predicated region fallthrough
CT: control target
= control target key end

     0   :  { %8 = vsyncpa [#allocation3], 0  ;;  %s233_s0 = inlined_call_operand.hbm [shape: f32[8,128], index: 0, kind: input, shape index: {}]   ;;  %s234_s1 = inlined_call_operand.hbm [shape: f32[1,128,128], index: 1, kind: input, shape index: {}]   ;;  %s235_s2 = inlined_call_operand.vmem [shape: f32[1,128], index: 2, kind: input, shape index: {}]   ;;  %s236_s3 = inlined_call_operand.hbm [shape: f32[8,128], index: 3, kind: output, shape index: {}]  }
   0x1   :  { %9 = vsyncpa [#allocation6], 0 }
   0x2   :  { %10 = vsyncpa [#allocation4], 0  ;;  %s16_s14 = sshll.u32 %s233_s0, 4  ;;  %s196_s15 = smov [#allocation2]   ;;  %s17_s14 = int_to_ptr.hbm [resolvable:$true] %s16_s14 }
   0x3   :  { %s18_s16 = sshll.u32 %s196_s15, 4  ;;  %s26_s19 = sshll.u32 %s234_s1, 4  ;;  %s19_s16 = int_to_ptr.vmem [resolvable:$true] %s18_s16  ;;  %s27_s19 = int_to_ptr.hbm [resolvable:$true] %s26_s19 }
   0x4   :  { %21 = dma.hbm_to_vmem [thread:$0]  %s17_s14, 128, %s19_s16, [#allocation3]  }
   0x5   :  { %s197_s20 = smov [#allocation5]   ;;  %s198_s22 = smov 128  }
   0x6   :  { %s28_s21 = sshll.u32 %s197_s20, 4  ;;  %s199_s23 = smov 8   ;;  %s29_s21 = int_to_ptr.vmem [resolvable:$true] %s28_s21 }
   0x7   :  { %34 = dma.hbm_to_vmem [thread:$0]  %s27_s19, 2048, %s29_s21, [#allocation6], %s198_s22, %s198_s22, %s199_s23  }
   0x8   :  { %190 = dma.done.wait [#allocation3], 128  }
   0x9   :  { %191 = vsyncadd [#allocation3], 4294967168 }
   0xa   :  { %192 = dma.done.wait [#allocation6], 2048  }
   0xb   :  { %193 = vsyncadd [#allocation6], 4294965248  ;;  %v71_v0 = vld [vmem:[#allocation5 + $0x78] sm:$0xff]  ;;  %v70_v1 = vld [vmem:[#allocation5 + $0x70] sm:$0xff]  ;;  %s200_s24 = smov [#allocation7]   ;;  %s101_s28 = sshll.u32 %s236_s3, 4  ;;  %s102_s28 = int_to_ptr.hbm [resolvable:$true] %s101_s28 }
   0xc   :  { %72 = vmatpush.msra.mxu0 %v71_v0  ;;  %v69_v2 = vld [vmem:[#allocation5 + $0x68] sm:$0xff]  ;;  %v68_v3 = vld [vmem:[#allocation5 + $0x60] sm:$0xff]  ;;  %v67_v4 = vld [vmem:[#allocation5 + $0x58] sm:$0xff]  ;;  %s99_s25 = sshll.u32 %s200_s24, 4  ;;  %s100_s25 = int_to_ptr.vmem [resolvable:$true] %s99_s25 }
   0xd   :  { %v66_v5 = vld [vmem:[#allocation5 + $0x50] sm:$0xff]  ;;  %v65_v6 = vld [vmem:[#allocation5 + $0x48] sm:$0xff]  ;;  %v64_v7 = vld [vmem:[#allocation5 + $0x40] sm:$0xff] }
   0xe   :  { %73 = vmatpush.msra.mxu0 %v70_v1  ;;  %v63_v8 = vld [vmem:[#allocation5 + $0x38] sm:$0xff]  ;;  %v62_v9 = vld [vmem:[#allocation5 + $0x30] sm:$0xff]  ;;  %v61_v10 = vld [vmem:[#allocation5 + $0x28] sm:$0xff] }
   0xf   :  { %v60_v11 = vld [vmem:[#allocation5 + $0x20] sm:$0xff]  ;;  %v59_v12 = vld [vmem:[#allocation5 + $0x18] sm:$0xff]  ;;  %v58_v13 = vld [vmem:[#allocation5 + $0x10] sm:$0xff] }
  0x10   :  { %74 = vmatpush.msra.mxu0 %v69_v2  ;;  %v57_v14 = vld [vmem:[#allocation5 + $0x8] sm:$0xff]  ;;  %v56_v15 = vld [vmem:[#allocation5] sm:$0xff]  ;;  %v55_v16 = vld [vmem:[#allocation2] sm:$0xff] }
  0x11   :  { %v117_v17 = vld [vmem:[%s235_s2] ss:$0 sm:$0xff] }
  0x12   :  { %75 = vmatpush.msra.mxu0 %v68_v3 }
  0x14   :  { %76 = vmatpush.msra.mxu0 %v67_v4 }
  0x16   :  { %77 = vmatpush.msra.mxu0 %v66_v5 }
  0x18   :  { %78 = vmatpush.msra.mxu0 %v65_v6 }
  0x1a   :  { %79 = vmatpush.msra.mxu0 %v64_v7 }
  0x1c   :  { %80 = vmatpush.msra.mxu0 %v63_v8 }
  0x1e   :  { %81 = vmatpush.msra.mxu0 %v62_v9 }
  0x20   :  { %82 = vmatpush.msra.mxu0 %v61_v10 }
  0x22   :  { %83 = vmatpush.msra.mxu0 %v60_v11 }
  0x24   :  { %84 = vmatpush.msra.mxu0 %v59_v12 }
  0x26   :  { %85 = vmatpush.msra.mxu0 %v58_v13 }
  0x28   :  { %86 = vmatpush.msra.mxu0 %v57_v14 }
  0x2a   :  { %87 = vmatpush.msra.mxu0 %v56_v15 }
  0x2b   :  { %88 = vmatmul.f32.vlgmr.msra.gmra.mxu0 %v55_v16 }
  0xa8   :  { %v89_v18 = vpop.f32.mrf.mxu0 }
  0xa9   :  { %v92_v19 = vadd.f32 %v117_v17, %v89_v18 }
  0xab   :  { %93 = vst [vmem:[#allocation7] sm:$0xff] %v92_v19 }
  0xac   :  { %104 = dma.vmem_to_hbm [thread:$0]  %s100_s25, 128, %s102_s28, [#allocation4]  }
  0xad   :  { %194 = dma.done.wait [#allocation4], 128  }
  0xae   :  { %195 = vsyncadd [#allocation4], 4294967168 }
  0xaf   :  { %109 = vsyncpa [#allocation3], 1 }
  0xb0   :  { %110 = vsyncpa [#allocation6], 1 }
  0xb1   :  { %111 = vsyncpa [#allocation4], 1 }

</bundles_post_ra>
